<compile_context>
chip_gen: v7x
topology: tpu7x:2x2x1
jax: 0.10.0
libtpu: 0.0.40
codegen_flags: <defaults>
</compile_context>

<pallas_src>
import jax
import jax.numpy as jnp
from jax.experimental import pallas as pl
from jax.experimental.pallas import tpu as pltpu

LANE = 128


def _netgcn_kernel(adj_rows_ref, adj_cols_ref, feat_ref, w1_ref, v_ref,
                   out_ref, pooled_ref):
    # Per-(graph b, row-tile t) blocks:
    #   adj_rows_ref : (1, TN, Np)  bf16 0/1  -- rows  [t*TN, (t+1)*TN) of A
    #   adj_cols_ref : (1, Np, TN)  bf16 0/1  -- cols  [t*TN, (t+1)*TN) of A
    #   feat_ref     : (1, Np, F)   bf16      -- full (node-padded) feature block
    #   w1_ref       : (F, Dp)      f32       -- hidden dim zero-padded to 128
    #   v_ref        : (Dp, 128)    f32       -- col 0 = (W2 @ Wfc)/N, rest zero
    #   out_ref      : (1, 1, 128)  f32       -- lane 0 = sigmoid(logit)
    #   pooled_ref   : (1, Dp)      f32 VMEM scratch, accumulated over row tiles
    t = pl.program_id(1)

    @pl.when(t == 0)
    def _():
        pooled_ref[...] = jnp.zeros_like(pooled_ref)

    a_rows = adj_rows_ref[0]                                   # (TN, Np) bf16
    a_cols = adj_cols_ref[0]                                   # (Np, TN) bf16
    x = feat_ref[0]                                            # (Np, F)  bf16
    n_pad = a_cols.shape[0]

    # conv1, re-associated: (A @ X) @ W1 -- dominant matmul on the bf16 MXU path,
    # f32 accumulation (adjacency 0/1 is exact in bf16).
    ax = jnp.dot(a_rows, x, preferred_element_type=jnp.float32)        # (TN, F)
    h1 = jnp.maximum(
        jnp.dot(ax, w1_ref[...], preferred_element_type=jnp.float32), 0.0)  # (TN, Dp)

    # Column sums of A for this tile's columns via MXU matvec (exact 0/1 sums in f32
    # accumulation, no XLU reduction).  1/N is folded into v in the wrapper.
    ones_row = jnp.ones((1, n_pad), dtype=jnp.bfloat16)
    c = jnp.dot(ones_row, a_cols, preferred_element_type=jnp.float32)  # (1, TN)

    # Partial pooled vector: sum_j c[j] * h1[j, :]
    pooled_ref[...] += jnp.dot(c, h1, preferred_element_type=jnp.float32)  # (1, Dp)

    @pl.when(t == pl.num_programs(1) - 1)
    def _():
        logit = jnp.dot(pooled_ref[...], v_ref[...],
                        preferred_element_type=jnp.float32)             # (1, 128)
        # single-exp, overflow-free sigmoid (lanes 1..127 carry logit==0 -> 0.5,
        # sliced off in the wrapper)
        e = jnp.exp(-jnp.abs(logit))
        r = 1.0 / (1.0 + e)
        out_ref[...] = jnp.where(logit >= 0.0, r, e * r)[None]          # (1, 1, 128)


def _pad_axis(x, target, axis):
    pad = [(0, 0)] * x.ndim
    pad[axis] = (0, target - x.shape[axis])
    return jnp.pad(x, pad)


def netgcn_forward(adj, feat, w1, w2, wf, *, row_tile=256):
    B, N, _ = adj.shape
    F_in = feat.shape[-1]
    D = w1.shape[-1]
    Dp = pl.cdiv(D, LANE) * LANE

    # Node axis padded so row tiles divide evenly and match bf16 sublane packing (16).
    # Zero rows/cols are inert for A@X, colsum and h1; divisor below is the true N.
    if N <= row_tile:
        TN = pl.cdiv(N, 16) * 16
        Np = TN
    else:
        TN = row_tile
        Np = pl.cdiv(N, TN) * TN
    n_tiles = Np // TN

    # Adjacency is 0/1 -> exact in bf16; feat cast to bf16 so the N^2 matmul runs on the
    # native bf16 MXU path (only rounding source is the feat cast, ~2^-9 relative).
    adj_b = _pad_axis(_pad_axis(adj, Np, 1), Np, 2).astype(jnp.bfloat16)
    feat_b = _pad_axis(feat, Np, 1).astype(jnp.bfloat16)

    w1_p = _pad_axis(w1, Dp, axis=1)                       # (F_in, Dp), f32
    # Fold conv2 + fc1 + mean divisor: v = (W2 @ Wfc) / N, padded to (Dp, 128),
    # real logit lives in lane 0.
    # TODO(synk): for true dgl.batch semantics with variable per-graph node counts,
    # pass per-graph counts via PrefetchScalarGridSpec and divide per graph instead.
    v_p = _pad_axis(_pad_axis((w2 @ wf) * (1.0 / N), Dp, axis=0), LANE, axis=1)

    out = pl.pallas_call(
        _netgcn_kernel,
        out_shape=jax.ShapeDtypeStruct((B, 1, LANE), jnp.float32),
        grid=(B, n_tiles),
        in_specs=[
            pl.BlockSpec((1, TN, Np), lambda b, t: (b, t, 0)),    # adj row tile
            pl.BlockSpec((1, Np, TN), lambda b, t: (b, 0, t)),    # adj column tile
            pl.BlockSpec((1, Np, F_in), lambda b, t: (b, 0, 0)),  # feat (unpadded lanes)
            pl.BlockSpec((F_in, Dp), lambda b, t: (0, 0)),
            pl.BlockSpec((Dp, LANE), lambda b, t: (0, 0)),
        ],
        out_specs=pl.BlockSpec((1, 1, LANE), lambda b, t: (b, 0, 0)),
        scratch_shapes=[pltpu.VMEM((1, Dp), jnp.float32)],
        compiler_params=pltpu.CompilerParams(
            dimension_semantics=("parallel", "arbitrary"),
            # Explicit scoped VMEM (safe on v5e/v6e/v7x); with TN=256 the double-buffered
            # bf16 adj blocks stay a few MiB even at N in the thousands.
            vmem_limit_bytes=32 * 1024 * 1024),
    )(adj_b, adj_b, feat_b, w1_p, v_p)
    return out[:, 0, :1]                                          # (B, 1)


def netgcn_reference(adj, feat, w1, w2, wf):
    # pure-JAX reference matching the PyTorch/DGL forward
    h1 = jnp.maximum(jnp.einsum('bnm,bmd->bnd', adj, feat @ w1), 0.0)
    h2 = jnp.einsum('bnm,bmd->bnd', adj, h1 @ w2)
    m = jnp.mean(h2, axis=1)
    return jax.nn.sigmoid(m @ wf)


if __name__ == "__main__":
    B, N = 2, 16          # 2 graphs, 16 nodes each
    NUM_FEATURES = 8
    DIM = 10              # matches NetGCN(dim=10)

    key = jax.random.PRNGKey(0)
    k_adj, k_feat, k_w1, k_w2, k_wf = jax.random.split(key, 5)

    # deterministic random graph structure (A[b, i, j] = 1 iff edge j -> i)
    adj = (jax.random.uniform(k_adj, (B, N, N)) < 0.3).astype(jnp.float32)
    feat = jax.random.normal(k_feat, (B, N, NUM_FEATURES), dtype=jnp.float32)

    # deterministic parameter init (Glorot-ish scaling; synthetic, not a checkpoint)
    w1 = jax.random.normal(k_w1, (NUM_FEATURES, DIM), dtype=jnp.float32) * (
        (2.0 / (NUM_FEATURES + DIM)) ** 0.5)
    w2 = jax.random.normal(k_w2, (DIM, DIM), dtype=jnp.float32) * (
        (2.0 / (DIM + DIM)) ** 0.5)
    wf = jax.random.normal(k_wf, (DIM, 1), dtype=jnp.float32) * (
        (2.0 / (DIM + 1)) ** 0.5)

    out = netgcn_forward(adj, feat, w1, w2, wf)
    out = jax.block_until_ready(out)
    assert out.shape == (B, 1)

    # Kernel math check against a reference fed the same bf16-rounded features
    # (isolates kernel correctness from input quantization): tight tolerance.
    ref_bf16_in = netgcn_reference(
        adj, feat.astype(jnp.bfloat16).astype(jnp.float32), w1, w2, wf)
    assert bool(jnp.allclose(out, ref_bf16_in, atol=1e-4, rtol=1e-4))

    # End-to-end check against the exact f32 module semantics: loose tolerance that
    # budgets the ~2^-9 relative error from the bf16 feature cast on the MXU path.
    ref_f32 = netgcn_reference(adj, feat, w1, w2, wf)
    assert bool(jnp.allclose(out, ref_f32, atol=5e-2, rtol=5e-2))

    print("KERNEL_OK")
</pallas_src>

<mosaic_0001>
module attributes {stable_mosaic.version = 11 : i64} {
  func.func @_netgcn_kernel(%arg0: i32, %arg1: i32, %arg2: memref<1x16x16xbf16, #tpu.memory_space<vmem>>, %arg3: memref<1x16x16xbf16, #tpu.memory_space<vmem>>, %arg4: memref<1x16x8xbf16, #tpu.memory_space<vmem>>, %arg5: memref<8x128xf32, #tpu.memory_space<vmem>>, %arg6: memref<128x128xf32, #tpu.memory_space<vmem>>, %arg7: memref<1x1x128xf32, #tpu.memory_space<vmem>>, %arg8: memref<1x128xf32, #tpu.memory_space<vmem>>) attributes {dimension_semantics = [#tpu.dimension_semantics<parallel>, #tpu.dimension_semantics<arbitrary>], iteration_bounds = array<i64: 2, 1>, scalar_prefetch = 0 : i64, scratch_operands = 1 : i64, tpu.core_type = #tpu.core_type<tc>, window_params = [{transform_indices = @transform_0, window_bounds = array<i64: 1, 16, 16>}, {transform_indices = @transform_1, window_bounds = array<i64: 1, 16, 16>}, {transform_indices = @transform_2, window_bounds = array<i64: 1, 16, 8>}, {pipeline_mode = #tpu.pipeline_mode<synchronous>, transform_indices = @transform_3, window_bounds = array<i64: 8, 128>}, {pipeline_mode = #tpu.pipeline_mode<synchronous>, transform_indices = @transform_4, window_bounds = array<i64: 128, 128>}, {transform_indices = @transform_5, window_bounds = array<i64: 1, 1, 128>}]} {
    %c0_i32 = arith.constant 0 : i32
    %0 = arith.cmpi eq, %arg1, %c0_i32 : i32
    %1 = arith.extui %0 : i1 to i32
    %c0_i32_0 = arith.constant 0 : i32
    %2 = arith.cmpi ne, %1, %c0_i32_0 : i32
    scf.if %2 {
      %cst_22 = arith.constant 0.000000e+00 : f32
      %23 = vector.broadcast %cst_22 : f32 to vector<1x128xf32>
      %c0_23 = arith.constant 0 : index
      %c0_24 = arith.constant 0 : index
      %24 = vector.load %arg8[%c0_23, %c0_24] : memref<1x128xf32, #tpu.memory_space<vmem>>, vector<1x128xf32>
      tpu.vector_store %arg8[%c0_23, %c0_24], %23 {strides = array<i32>} : memref<1x128xf32, #tpu.memory_space<vmem>>, vector<1x128xf32>,
    } else {
    }
    %c0 = arith.constant 0 : index
    %c0_1 = arith.constant 0 : index
    %c0_2 = arith.constant 0 : index
    %3 = vector.load %arg2[%c0, %c0_1, %c0_2] : memref<1x16x16xbf16, #tpu.memory_space<vmem>>, vector<1x16x16xbf16>
    %4 = vector.shape_cast %3 : vector<1x16x16xbf16> to vector<16x16xbf16>
    %c0_3 = arith.constant 0 : index
    %c0_4 = arith.constant 0 : index
    %c0_5 = arith.constant 0 : index
    %5 = vector.load %arg3[%c0_3, %c0_4, %c0_5] : memref<1x16x16xbf16, #tpu.memory_space<vmem>>, vector<1x16x16xbf16>
    %6 = vector.shape_cast %5 : vector<1x16x16xbf16> to vector<16x16xbf16>
    %c0_6 = arith.constant 0 : index
    %c0_7 = arith.constant 0 : index
    %c0_8 = arith.constant 0 : index
    %7 = vector.load %arg4[%c0_6, %c0_7, %c0_8] : memref<1x16x8xbf16, #tpu.memory_space<vmem>>, vector<1x16x8xbf16>
    %8 = vector.shape_cast %7 : vector<1x16x8xbf16> to vector<16x8xbf16>
    %cst = arith.constant dense<0.000000e+00> : vector<16x8xf32>
    %9 = tpu.matmul %4, %8, %cst {dimension_numbers = #tpu.dot_dimension_numbers<[1], [0], [0], [1], [0, 0, 1, 1], [], []>} : vector<16x16xbf16>, vector<16x8xbf16>, vector<16x8xf32> -> vector<16x8xf32>
    %c0_9 = arith.constant 0 : index
    %c0_10 = arith.constant 0 : index
    %10 = vector.load %arg5[%c0_9, %c0_10] : memref<8x128xf32, #tpu.memory_space<vmem>>, vector<8x128xf32>
    %cst_11 = arith.constant dense<0.000000e+00> : vector<16x128xf32>
    %11 = tpu.matmul %9, %10, %cst_11 {dimension_numbers = #tpu.dot_dimension_numbers<[1], [0], [0], [1], [0, 0, 1, 1], [], []>} : vector<16x8xf32>, vector<8x128xf32>, vector<16x128xf32> -> vector<16x128xf32>
    %cst_12 = arith.constant 0.000000e+00 : f32
    %12 = vector.broadcast %cst_12 : f32 to vector<16x128xf32>
    %13 = arith.maximumf %11, %12 : vector<16x128xf32>
    %cst_13 = arith.constant 1.000000e+00 : bf16
    %14 = vector.broadcast %cst_13 : bf16 to vector<1x16xbf16>
    %cst_14 = arith.constant dense<0.000000e+00> : vector<1x16xf32>
    %15 = tpu.matmul %14, %6, %cst_14 {dimension_numbers = #tpu.dot_dimension_numbers<[1], [0], [0], [1], [0, 0, 1, 1], [], []>} : vector<1x16xbf16>, vector<16x16xbf16>, vector<1x16xf32> -> vector<1x16xf32>
    %c0_15 = arith.constant 0 : index
    %c0_16 = arith.constant 0 : index
    %16 = vector.load %arg8[%c0_15, %c0_16] : memref<1x128xf32, #tpu.memory_space<vmem>>, vector<1x128xf32>
    %cst_17 = arith.constant dense<0.000000e+00> : vector<1x128xf32>
    %17 = tpu.matmul %15, %13, %cst_17 {dimension_numbers = #tpu.dot_dimension_numbers<[1], [0], [0], [1], [0, 0, 1, 1], [], []>} : vector<1x16xf32>, vector<16x128xf32>, vector<1x128xf32> -> vector<1x128xf32>
    %18 = arith.addf %16, %17 : vector<1x128xf32>
    %c0_18 = arith.constant 0 : index
    %c0_19 = arith.constant 0 : index
    %19 = vector.load %arg8[%c0_18, %c0_19] : memref<1x128xf32, #tpu.memory_space<vmem>>, vector<1x128xf32>
    tpu.vector_store %arg8[%c0_18, %c0_19], %18 {strides = array<i32>} : memref<1x128xf32, #tpu.memory_space<vmem>>, vector<1x128xf32>,
    %c0_i32_20 = arith.constant 0 : i32
    %20 = arith.cmpi eq, %arg1, %c0_i32_20 : i32
    %21 = arith.extui %20 : i1 to i32
    %c0_i32_21 = arith.constant 0 : i32
    %22 = arith.cmpi ne, %21, %c0_i32_21 : i32
    scf.if %22 {
      %c0_22 = arith.constant 0 : index
      %c0_23 = arith.constant 0 : index
      %23 = vector.load %arg8[%c0_22, %c0_23] : memref<1x128xf32, #tpu.memory_space<vmem>>, vector<1x128xf32>
      %c0_24 = arith.constant 0 : index
      %c0_25 = arith.constant 0 : index
      %24 = vector.load %arg6[%c0_24, %c0_25] : memref<128x128xf32, #tpu.memory_space<vmem>>, vector<128x128xf32>
      %cst_26 = arith.constant dense<0.000000e+00> : vector<1x128xf32>
      %25 = tpu.matmul %23, %24, %cst_26 {dimension_numbers = #tpu.dot_dimension_numbers<[1], [0], [0], [1], [0, 0, 1, 1], [], []>} : vector<1x128xf32>, vector<128x128xf32>, vector<1x128xf32> -> vector<1x128xf32>
      %26 = math.absf %25 : vector<1x128xf32>
      %cst_27 = arith.constant 0.000000e+00 : f32
      %27 = vector.broadcast %cst_27 : f32 to vector<1x128xf32>
      %28 = arith.subf %27, %26 : vector<1x128xf32>
      %29 = math.exp %28 : vector<1x128xf32>
      %cst_28 = arith.constant 1.000000e+00 : f32
      %30 = vector.broadcast %cst_28 : f32 to vector<1x128xf32>
      %31 = arith.addf %30, %29 : vector<1x128xf32>
      %cst_29 = arith.constant 1.000000e+00 : f32
      %32 = vector.broadcast %cst_29 : f32 to vector<1x128xf32>
      %33 = arith.divf %32, %31 : vector<1x128xf32>
      %cst_30 = arith.constant 0.000000e+00 : f32
      %34 = vector.broadcast %cst_30 : f32 to vector<1x128xf32>
      %35 = arith.cmpf oge, %25, %34 : vector<1x128xf32>
      %36 = arith.mulf %29, %33 : vector<1x128xf32>
      %37 = arith.select %35, %33, %36 : vector<1x128xi1>, vector<1x128xf32>
      %38 = vector.shape_cast %37 : vector<1x128xf32> to vector<1x1x128xf32>
      %c0_31 = arith.constant 0 : index
      %c0_32 = arith.constant 0 : index
      %c0_33 = arith.constant 0 : index
      %39 = vector.load %arg7[%c0_31, %c0_32, %c0_33] : memref<1x1x128xf32, #tpu.memory_space<vmem>>, vector<1x1x128xf32>
      tpu.vector_store %arg7[%c0_31, %c0_32, %c0_33], %38 {strides = array<i32>} : memref<1x1x128xf32, #tpu.memory_space<vmem>>, vector<1x1x128xf32>,
    } else {
    }
    return
  }
  func.func @transform_0(%arg0: i32, %arg1: i32) -> (i32, i32, i32) {
    %c0_i32 = arith.constant 0 : i32
    %c0_i32_0 = arith.constant 0 : i32
    return %arg0, %arg1, %c0_i32 : i32, i32, i32
  }
  func.func @transform_1(%arg0: i32, %arg1: i32) -> (i32, i32, i32) {
    %c0_i32 = arith.constant 0 : i32
    %c0_i32_0 = arith.constant 0 : i32
    return %arg0, %c0_i32, %arg1 : i32, i32, i32
  }
  func.func @transform_2(%arg0: i32, %arg1: i32) -> (i32, i32, i32) {
    %c0_i32 = arith.constant 0 : i32
    %c0_i32_0 = arith.constant 0 : i32
    %c0_i32_1 = arith.constant 0 : i32
    return %arg0, %c0_i32, %c0_i32_0 : i32, i32, i32
  }
  func.func @transform_3(%arg0: i32, %arg1: i32) -> (i32, i32) {
    %c0_i32 = arith.constant 0 : i32
    %c0_i32_0 = arith.constant 0 : i32
    %c0_i32_1 = arith.constant 0 : i32
    return %c0_i32, %c0_i32_0 : i32, i32
  }
  func.func @transform_4(%arg0: i32, %arg1: i32) -> (i32, i32) {
    %c0_i32 = arith.constant 0 : i32
    %c0_i32_0 = arith.constant 0 : i32
    %c0_i32_1 = arith.constant 0 : i32
    return %c0_i32, %c0_i32_0 : i32, i32
  }
  func.func @transform_5(%arg0: i32, %arg1: i32) -> (i32, i32, i32) {
    %c0_i32 = arith.constant 0 : i32
    %c0_i32_0 = arith.constant 0 : i32
    %c0_i32_1 = arith.constant 0 : i32
    return %arg0, %c0_i32, %c0_i32_0 : i32, i32, i32
  }
}

</mosaic_0001>

<bundles_post_ra>
// kernel: tpu_custom_call.1
= control target key start
LH: loop header
LB: loop body
LE: loop exit
PB: predicated region body
PF: predicated region fallthrough
CT: control target
= control target key end

     0   :  { %10 = vsyncpa [#allocation4], 0  ;;  %s1490_s0 = inlined_call_operand.vmem [shape: bf16[2,16,16], index: 0, kind: input, shape index: {}]   ;;  %s1491_s1 = inlined_call_operand.hbm [shape: bf16[2,16,16], index: 1, kind: input, shape index: {}]   ;;  %s1492_s2 = inlined_call_operand.vmem [shape: bf16[2,16,8], index: 2, kind: input, shape index: {}]   ;;  %s1493_s3 = inlined_call_operand.vmem [shape: f32[8,128], index: 3, kind: input, shape index: {}]   ;;  %s1494_s4 = inlined_call_operand.hbm [shape: f32[128,128], index: 4, kind: input, shape index: {}]   ;;  %s1495_s5 = inlined_call_operand.hbm [shape: f32[2,1,128], index: 5, kind: output, shape index: {}]  }
   0x1   :  { %12 = vsyncpa [#allocation4 + $0x1], 0 }
   0x2   :  { %13 = vsyncpa [#allocation7], 0 }
   0x3   :  { %14 = vsyncpa [#allocation5], 0 }
   0x4   :  { %16 = vsyncpa [#allocation5 + $0x1], 0  ;;  %s1254_s18 = smov 0   ;;  %s1256_s19 = smov 0  }
   0x5   :  { %s1258_s20 = smov 0   ;;  %s1260_s21 = smov 0  }
   0x6   :  { %s1262_s22 = smov 0   ;;  %s1264_s23 = smov 0  }
   0x7 LB: > { %s837_s24 = sadd.s32 4294967295, %s1211_s23   ;;  %s838_s25 = sadd.s32 4294967294, %s1211_s23   ;;  %s1211_s23 = sphi %s1264_s23, %s22_s23   ;;  %s1207_s22 = sphi %s1262_s22, %s1519_s22   ;;  %s1203_s21 = sphi %s1260_s21, %s1518_s21   ;;  %s1199_s20 = sphi %s1258_s20, %s1517_s20   ;;  %s1195_s19 = sphi %s1256_s19, %s1516_s19   ;;  %s1191_s18 = sphi %s1254_s18, %s1515_s18  }
   0x8   : > { %p84_p0 = scmp.ne.s32.totalorder %s1195_s19, %s1191_s18  ;;  %p1288_p1 = scmp.eq.s32.totalorder %s837_s24, 0 }
   0x9   : > { %p1292_p2 = scmp.eq.s32.totalorder %s837_s24, 1  ;;  %p182_p3 = scmp.eq.s32.totalorder %s838_s25, 1 }
   0xa   : > { %s1500_s26 = scalar_select %p1288_p1, 1, 0 }
   0xb   : > { %s1501_s27 = scalar_select %p1292_p2, 1, 0 }
   0xc   : > { %p1298_p4 = por %p1288_p1, %p84_p0  ;;  %p839_p5 = scmp.ge.s32.totalorder %s1211_s23, 1 }
   0xd   : > { %p1303_p6 = por %p182_p3, %p84_p0  ;;  %p189_p7 = scmp.lt.s32.totalorder %s1211_s23, 3 }
   0xe   : > { %s1502_s28 = scalar_select %p1298_p4, 1, 0 }
   0xf   : > { %s1503_s29 = scalar_select %p1303_p6, 1, 0 }
  0x10   : > { %p1308_p8 = pnand %p839_p5, %p189_p7  ;;  %s1213_s6 = smov [#allocation6]  }
  0x11   : > { %s204_s7 = sshll.u32 %s1213_s6, 4  ;;  %s34_s9 = sadd.s32 1, %s1207_s22  ;;  %s205_s7 = int_to_ptr.vmem [resolvable:$true] %s204_s7 }
  0x12   : > { %s1504_s30 = scalar_select %p1308_p8, 1, 0 }
  0x13   : > { %p987_p9 = pneg %p1308_p8  ;;  %s1067_s12 = scalar_lea.hbm %s1494_s4, 2048 }
  0x14   : > { %p1068_p12 = scmp.ne.s32.totalorder %s1494_s4, %s1067_s12  ;;  %p1074_p5 = scmp.lt.u32.totalorder %s1067_s12, %s1494_s4 }
  0x15   : > { %p1317_p11 = pnand %p987_p9, %p1288_p1 }
  0x17   : > { %p1069_p13 = pneg %p1317_p11 }
  0x19   : > { %p1070_p0 = pnand %p1069_p13, %p1068_p12 }
  0x1b   : > { %p1071_p3 = pneg %p1070_p0 }
  0x1d   : > { %p1076_p7 = pnand %p1074_p5, %p1071_p3 }
  0x1f   : > { %1079 = shalt.err (!%p1076_p7)
}
  0x20   : > { %s1080_s17 = scalar_lea.vmem %s205_s7, 2048  ;;  %p1088_p1 = scmp.lt.s32.totalorder %s205_s7, %s205_s7 }
  0x21   : > { %p1081_p9 = scmp.ne.s32.totalorder %s205_s7, %s1080_s17  ;;  %p1089_p4 = scmp.lt.s32.totalorder %s1080_s17, %s1080_s17 }
  0x23   : > { %p1083_p10 = pnand %p1081_p9, %p1069_p13  ;;  %p1090_p8 = por %p1089_p4, %p1088_p1 }
  0x25   : > { %p1084_p6 = pneg %p1083_p10 }
  0x27   : > { %p1091_p2 = pnand %p1090_p8, %p1084_p6 }
  0x29   : > { %1094 = shalt.err (!%p1091_p2)
}
  0x2a   : > { %s1214_s24 = smov 128   ;;  %s1215_s25 = smov 8  }
  0x2b   : > { %990 = dma.hbm_to_vmem [thread:$0]  (!%p1317_p11), %s1494_s4, 2048, %s205_s7, [#allocation7], %s1214_s24, %s1214_s24, %s1215_s25  }
  0x2c   : > { %p36_p1 = scmp.ge.s32.totalorder %s34_s9, 2  ;;  %s71_s11 = sadd.s32 1, %s1199_s20 }
  0x2d   : > { %p78_p2 = scmp.ne.s32.totalorder %s1199_s20, %s1195_s19  ;;  %p79_p4 = scmp.eq.s32.totalorder %s1211_s23, 0 }
  0x2e   : > { %s1521_s9 = smov (%p36_p1, %s34_s9), 0  ;;  %p1507_p8 = scmp.ne.s32.totalorder %s1501_s27, 0 }
  0x2f   : > { %p1344_p6 = por %p79_p4, %p78_p2  ;;  %s66_s8 = ssub.s32 %s1207_s22, %s1521_s9 }
  0x30   : > { %p1350_p10 = por %p1507_p8, %p78_p2  ;;  %p1000_p12 = scmp.lt.s32.totalorder %s1211_s23, 2 }
  0x31   : > { %p69_p11 = scmp.eq.s32.totalorder %s66_s8, 0  ;;  %s231_s7 = sand.u32 1, %s1199_s20  }
  0x32   : > { %s842_s14 = sshll.u32 %s231_s7, 3  ;;  %s863_s16 = sshll.u32 %s1207_s22, 7 }
  0x33   : > { %s1359_s15 = scalar_select %p69_p11, %s1199_s20, %s71_s11  }
  0x34   : > { %s1365_s25 = scalar_lea.hbm %s1491_s1, %s863_s16  ;;  %s235_s27 = scalar_lea.vmem [#allocation3], %s842_s14 }
  0x35   : > { %s243_s6 = sshll.u32 %s235_s27, 4  ;;  %p1371_p13 = pnand %p1000_p12, %p1344_p6  ;;  %s1367_s6 = int_to_ptr.vmem [resolvable:$true] %s243_s6 }
  0x36   : > { %s1375_s11 = scalar_lea.sflag [#allocation4], %s231_s7  ;;  %s1095_s8 = scalar_lea.hbm %s1365_s25, 128 }
  0x37   : > { %p1096_p0 = scmp.ne.s32.totalorder %s1365_s25, %s1095_s8  ;;  %p1097_p3 = pneg %p1371_p13 }
  0x38   : > { %s1100_s12 = scalar_lea.hbm %s1491_s1, 256  ;;  %p1101_p9 = scmp.lt.u32.totalorder %s1365_s25, %s1491_s1 }
  0x39   : > { %p1098_p5 = pnand %p1097_p3, %p1096_p0  ;;  %p1102_p1 = scmp.lt.u32.totalorder %s1100_s12, %s1095_s8 }
  0x3a   : > { %p1104_p4 = scmp.lt.u32.totalorder %s1095_s8, %s1365_s25 }
  0x3b   : > { %p1099_p7 = pneg %p1098_p5  ;;  %p1103_p2 = por %p1102_p1, %p1101_p9 }
  0x3d   : > { %p1105_p6 = por %p1104_p4, %p1103_p2 }
  0x3f   : > { %p1106_p8 = pnand %p1105_p6, %p1099_p7 }
  0x41   : > { %1109 = shalt.err (!%p1106_p8)
}
  0x42   : > { %s1110_s7 = scalar_lea.vmem %s1367_s6, 128  ;;  %s1216_s27 = smov [#allocation3]  }
  0x43   : > { %p1111_p12 = scmp.ne.s32.totalorder %s1367_s6, %s1110_s7  ;;  %s1115_s14 = sshll.u32 %s1216_s27, 4  ;;  %s1116_s14 = int_to_ptr.vmem [resolvable:$false] %s1115_s14 }
  0x44   : > { %s1117_s16 = scalar_lea.vmem %s1116_s14, 256  ;;  %p1118_p5 = scmp.lt.s32.totalorder %s1367_s6, %s1116_s14 }
  0x45   : > { %p1113_p11 = pnand %p1111_p12, %p1097_p3  ;;  %p1119_p9 = scmp.lt.s32.totalorder %s1117_s16, %s1110_s7 }
  0x47   : > { %p1114_p0 = pneg %p1113_p11  ;;  %p1120_p1 = por %p1119_p9, %p1118_p5 }
  0x49   : > { %p1121_p2 = pnand %p1120_p1, %p1114_p0 }
  0x4b   : > { %1124 = shalt.err (!%p1121_p2)
}
  0x4c   : > { %s1217_s8 = smov 64   ;;  %s1218_s12 = smov 4  }
  0x4d   : > { %994 = dma.hbm_to_vmem [thread:$0]  (!%p1371_p13), %s1365_s25, 128, %s1367_s6, %s1375_s11, %s1217_s8, %s1217_s8, %s1218_s12  }
  0x4e   : > { %p1510_p3 = scmp.ne.s32.totalorder %s1504_s30, 0 }
  0x4f   : > { %s1406_s17 = sand.u32 (!%p1510_p3), 1, %s1195_s19   ;;  %p1511_p7 = scmp.ne.s32.totalorder (!%p1510_p3), %s1502_s28, 0 }
  0x50   : > { %263 = sbr.rel (%p1510_p3) target bundleno = 1016 (0x3f8), region = 40  ;;  %s846_s24 = sshll.u32 (!%p1510_p3), %s1406_s17, 3 }
  0x51   : > { %s266_s7 = scalar_lea.sflag (!%p1510_p3), [#allocation4], %s1406_s17  ;;  %s269_s27 = scalar_lea.vmem (!%p1510_p3), [#allocation3], %s846_s24 }
  0x57   : > { %1178 = dma.done.wait (%p1511_p7), %s266_s7, 128  }
  0x58   : > { %1180 = vsyncadd (%p1511_p7), %s266_s7, 4294967168  ;;  %p1512_p4 = scmp.ne.s32.totalorder %s1500_s26, 0 }
  0x5a   : > { %1182 = dma.done.wait (%p1512_p4), [#allocation7], 2048  }
  0x5b   : > { %1184 = vsyncadd (%p1512_p4), [#allocation7], 4294965248  ;;  %p314_p13 = scmp.lt.s32.totalorder %s1203_s21, 1  ;;  %v1219_v0 = vmov 0.0   ;;  %vm1220_vm0 = vmmov 0   ;;  %v397_v3 = vld [vmem:[%s1493_s3] sm:$0xff] }
  0x5c   : > { %893 = vmatprep.subr.bf16.mxu0 %v1219_v0  ;;  %334 = vst [vmem:[#allocation2] sm:$0x1] %v1219_v0  ;;  %895 = vmatprep.mubr.msk.bf16.mxu0 %vm1220_vm0, %v1219_v0  ;;  %vm352_vm1 = vcmask 130048   ;;  %vm398_vm2 = vcmask 64512   ;;  %v1062_v5 = vld [vmem:[%s269_s27] sm:$0xff]   ;;  %v1222_v10 = vmov 0.0|0.0  }
  0x5d   : > { %s315_s30 = scalar_select %p314_p13, %s1203_s21, 1  ;;  %949 = vmatprep.mubr.msk.f32.mxu1 %vm1220_vm0, %v1219_v0  ;;  %v1221_v9 = vmov 1065369472   ;;  %955 = vmatprep.subr.bf16.mxu1 %v1222_v10  ;;  %v611_v11 = vld [vmem:[#allocation6] sm:$0xff]  ;;  %v612_v12 = vld [vmem:[#allocation6 + $0x8] sm:$0xff]  ;;  %v613_v13 = vld [vmem:[#allocation6 + $0x10] sm:$0xff] }
  0x5e   : > { %v956_v14 = vpack.c.bf16 %v612_v12, %v611_v11  ;;  %v614_v15 = vld [vmem:[#allocation6 + $0x18] sm:$0xff]  ;;  %v615_v17 = vld [vmem:[#allocation6 + $0x20] sm:$0xff]  ;;  %v616_v18 = vld [vmem:[#allocation6 + $0x28] sm:$0xff]  ;;  %s860_s12 = sshll.u32 %s1203_s21, 4  ;;  %s312_s24 = scalar_lea.vmem [#allocation8], %s1406_s17 }
  0x5f   : > { %s864_s28 = sshll.u32 %s315_s30, 3  ;;  %v959_v16 = vpack.c.bf16 %v614_v15, %v613_v13  ;;  %v962_v19 = vpack.c.bf16 %v616_v18, %v615_v17  ;;  %v617_v20 = vld [vmem:[#allocation6 + $0x30] sm:$0xff]  ;;  %v618_v21 = vld [vmem:[#allocation6 + $0x38] sm:$0xff]  ;;  %v619_v23 = vld [vmem:[#allocation6 + $0x40] sm:$0xff]  ;;  %s721_s7 = sshll.u32 %s312_s24, 4  ;;  %s1443_s7 = int_to_ptr.vmem [resolvable:$true] %s721_s7 }
  0x60   : > { %s321_s10 = scalar_lea.vmem %s1490_s0, %s864_s28  ;;  %s327_s14 = scalar_lea.vmem %s1492_s2, %s864_s28  ;;  %957 = vmatpush3.bf16.msra.mxu1 %v956_v14  ;;  %v965_v22 = vpack.c.bf16 %v618_v21, %v617_v20  ;;  %v620_v24 = vld [vmem:[#allocation6 + $0x48] sm:$0xff]  ;;  %v621_v35 = vld [vmem:[#allocation6 + $0x50] sm:$0xff]  ;;  %v622_v36 = vld [vmem:[#allocation6 + $0x58] sm:$0xff] }
  0x61   : > { %v1060_v1 = vld [vmem:[%s327_s14] sm:$0xff]   ;;  %958 = vmatprep.subr.bf16.mxu1 %v1222_v10  ;;  %v968_v25 = vpack.c.bf16 %v620_v24, %v619_v23  ;;  %v971_v37 = vpack.c.bf16 %v622_v36, %v621_v35  ;;  %v623_v38 = vld [vmem:[#allocation6 + $0x60] sm:$0xff]  ;;  %v626_v42 = vld [vmem:[#allocation6 + $0x78] sm:$0xff]  ;;  %s1441_s28 = scalar_lea.hbm %s1495_s5, %s860_s12  ;;  %s709_s25 = scalar_lea.sflag [#allocation5], %s1406_s17 }
  0x62   : > { %v1061_v2 = vld [vmem:[%s321_s10] sm:$0xff]   ;;  %894 = vmatpush3.bf16.msra.mxu0 %v1060_v1  ;;  %s1125_s6 = scalar_lea.vmem %s1443_s7, 16  ;;  %s1223_s21 = smov [#allocation8]  }
  0x63   : > { %899 = vmatprep.subr.mxu0 %v397_v3  ;;  %v624_v39 = vld [vmem:[#allocation6 + $0x68] sm:$0xff]  ;;  %v625_v41 = vld [vmem:[#allocation6 + $0x70] sm:$0xff]  ;;  %p1126_p6 = scmp.ne.s32.totalorder %s1443_s7, %s1125_s6  ;;  %s1129_s10 = sshll.u32 %s1223_s21, 4  ;;  %s1130_s10 = int_to_ptr.vmem [resolvable:$false] %s1129_s10 }
  0x64   : > { %960 = vmatpush3.bf16.msra.mxu1 %v959_v16  ;;  %v974_v40 = vpack.c.bf16 %v624_v39, %v623_v38  ;;  %v977_v43 = vpack.c.bf16 %v626_v42, %v625_v41  ;;  %v531_v44 = vld [vmem:[#allocation2] sm:$0x1]  ;;  %s1131_s11 = scalar_lea.vmem %s1130_s10, 32  ;;  %p1132_p11 = scmp.lt.s32.totalorder %s1443_s7, %s1130_s10 }
  0x65   : > { %896 = vmatmul.mubr.msk.bf16.vlgmr.msra.gmra.mrb[0].mxu0 %vm352_vm1, %v1061_v2  ;;  %961 = vmatprep.subr.bf16.mxu1 %v1222_v10  ;;  %p1127_p8 = pnand %p1126_p6, %p1350_p10  ;;  %p1133_p0 = scmp.lt.s32.totalorder %s1131_s11, %s1125_s6 }
  0x66   : > { %900 = vmatpush3.msra.mxu0 %v397_v3 }
  0x67   : > { %904 = vmatprep.subr.bf16.mxu0 %v1219_v0  ;;  %p1128_p12 = pneg %p1127_p8  ;;  %p1134_p5 = por %p1133_p0, %p1132_p11 }
  0x68   : > { %963 = vmatpush3.bf16.msra.mxu1 %v962_v19 }
  0x69   : > { %964 = vmatprep.subr.bf16.mxu1 %v1222_v10  ;;  %p1135_p9 = pnand %p1134_p5, %p1128_p12 }
  0x6c   : > { %966 = vmatpush3.bf16.msra.mxu1 %v965_v22 }
  0x6d   : > { %967 = vmatprep.subr.bf16.mxu1 %v1222_v10 }
  0x70   : > { %969 = vmatpush3.bf16.msra.mxu1 %v968_v25 }
  0x71   : > { %970 = vmatprep.subr.bf16.mxu1 %v1222_v10 }
  0x74   : > { %972 = vmatpush3.bf16.msra.mxu1 %v971_v37 }
  0x75   : > { %973 = vmatprep.subr.bf16.mxu1 %v1222_v10 }
  0x78   : > { %975 = vmatpush3.bf16.msra.mxu1 %v974_v40 }
  0x79   : > { %976 = vmatprep.subr.bf16.mxu1 %v1222_v10 }
  0x7c   : > { %978 = vmatpush3.bf16.msra.mxu1 %v977_v43 }
 0x138   : > { %v390_v4 = vpop.f32.mrb[0].mxu0 }
 0x139   : > { %v897_v6 = vpop.f32.mrb[1].mxu0  ;;  %901 = vmatprep.mubr.msk.f32.mxu0 %vm398_vm2, %v390_v4 }
 0x13a   : > { %v393_v7 = vpop.f32.mrb[2].mxu0 }
 0x13b   : > { %v898_v8 = vpop.f32.mrb[3].mxu0  ;;  %902 = vmatmul.mubr.msk.f32.vlgmr.msra.gmra.mrb[4].mxu0 %vm398_vm2, %v393_v7 }
 0x13c   : > { %905 = vmatpush3.bf16.msra.mxu0 %v1062_v5  ;;  %906 = vmatprep.mubr.msk.bf16.mxu0 %vm1220_vm0, %v1219_v0 }
 0x13d   : > { %952 = vmatprep.subr.bf16.mxu0 %v1222_v10 }
 0x13f   : > { %907 = vmatmul.mubr.msk.bf16.vlgmr.msra.gmra.mrb[8].mxu0 %vm352_vm1, %v1221_v9 }
 0x140   : > { %914 = vmatprep.mubr.msk.f32.mxu0 %vm1220_vm0, %v1219_v0 }
 0x20e   : > { %v903_v26 = vpop.f32.mrb[4].mxu0 }
 0x20f   : > { %v481_v27 = vmax.f32 %v903_v26, 0.0  ;;  %v471_v28 = vpop.f32.mrb[5].mxu0 }
 0x210   : > { %v480_v29 = vmax.f32 %v471_v28, 0.0 }
 0x212   : > { %v953_v30 = vpack.c.bf16 %v481_v27, %v480_v29  ;;  %v525_v31 = vpop.f32.mrb[8].mxu0 }
 0x213   : > { %v908_v32 = vpop.f32.mrb[9].mxu0 }
 0x214   : > { %954 = vmatpush3.bf16.msra.mxu0 %v953_v30  ;;  %v528_v33 = vpop.f32.mrb[10].mxu0 }
 0x215   : > { %v909_v34 = vpop.f32.mrb[11].mxu0 }
 0x217   : > { %915 = vmatmul.mubr.msk.f32.vlgmr.msra.gmra.mrb[6].mxu0 %vm352_vm1, %v525_v31 }
 0x2ea   : > { %v601_v45 = vpop.f32.mrb[6].mxu0 }
 0x2eb   : > { %v605_v46 = vadd.f32 %v601_v45, %v531_v44  ;;  %v916_v47 = vpop.f32.mrb[7].mxu0 }
 0x2ed   : > { %606 = vst [vmem:[#allocation2] sm:$0x1] %v605_v46 }
 0x2f4   : > { %v610_v48 = vld [vmem:[#allocation2] sm:$0x1] }
 0x2f5   : > { %950 = vmatmul.mubr.f32.vlgmr.msra.gmra.mrb[0].mxu1 %v610_v48 }
 0x3c8   : > { %v693_v49 = vpop.f32.mrb[0].mxu1 }
 0x3c9   : > { %v697_v50 = vand.u32 2147483647, %v693_v49  ;;  %v951_v51 = vpop.f32.mrb[1].mxu1  ;;  %vm704_vm3 = vcmp.ge.f32.partialorder %v693_v49, 0.0 }
 0x3cb   : > { %v698_v52 = vsub.f32 0.0, %v697_v50 }
 0x3cd   : > { %v699_v53 = vmul.f32 1.442695, %v698_v52 }
 0x3cf   : > { %1063 = vpow2.f32 %v699_v53 }
 0x3d9   : > { %v1064_v54 = vpop.eup %1063 }
 0x3da   : > { %v701_v55 = vadd.f32 1.0, %v1064_v54 }
 0x3dc   : > { %1065 = vrcp.f32 %v701_v55 }
 0x3e6   : > { %v1066_v56 = vpop.eup %1065 }
 0x3e7   : > { %v705_v57 = vmul.f32 %v1066_v56, %v1064_v54 }
 0x3e9   : > { %v706_v58 = vsel %vm704_vm3, %v1066_v56, %v705_v57 }
 0x3ea   : > { %707 = vst [vmem:[%s312_s24] sm:$0x1] %v706_v58 }
 0x3eb   : > { %1138 = shalt.err (!%p1135_p9)
}
 0x3ec   : > { %s1139_s17 = scalar_lea.hbm %s1441_s28, 16  ;;  %s1143_s16 = scalar_lea.hbm %s1495_s5, 32 }
 0x3ed   : > { %p1140_p1 = scmp.ne.s32.totalorder %s1441_s28, %s1139_s17  ;;  %p1144_p7 = scmp.lt.u32.totalorder %s1441_s28, %s1495_s5 }
 0x3ee   : > { %p1145_p4 = scmp.lt.u32.totalorder %s1143_s16, %s1139_s17  ;;  %p1147_p6 = scmp.lt.u32.totalorder %s1139_s17, %s1441_s28 }
 0x3ef   : > { %p1141_p2 = pnand %p1140_p1, %p1350_p10 }
 0x3f0   : > { %p1146_p13 = por %p1145_p4, %p1144_p7 }
 0x3f1   : > { %p1142_p3 = pneg %p1141_p2 }
 0x3f2   : > { %p1148_p8 = por %p1147_p6, %p1146_p13 }
 0x3f4   : > { %p1149_p12 = pnand %p1148_p8, %p1142_p3 }
 0x3f6   : > { %1152 = shalt.err (!%p1149_p12)
}
 0x3f7   : > { %985 = dma.vmem_to_hbm [thread:$0]  (%p1350_p10), %s1443_s7, 16, %s1441_s28, %s709_s25  }
 0x3f8 PF: > { %s733_s24 = sand.u32 1, %s1191_s18   ;;  %p1513_p11 = scmp.ne.s32.totalorder %s1503_s29, 0 }
 0x3f9   : > { %p1514_p0 = scmp.ge.s32.totalorder %s1211_s23, 2  ;;  %s734_s27 = scalar_lea.sflag [#allocation5], %s733_s24 }
 0x3fb   : > { %p996_p5 = pnand %p1514_p0, %p1513_p11 }
 0x3fd   : > { %1186 = dma.done.wait (!%p996_p5), %s734_s27, 16  }
 0x3fe   : > { %1188 = vsyncadd (!%p996_p5), %s734_s27, 4294967280  ;;  %s22_s23 = sadd.s32 1, %s1211_s23   ;;  %s1515_s18 = smov %s1195_s19 }
 0x3ff   : > { %p19_p9 = scmp.ge.s32.totalorder %s22_s23, 4   ;;  %s1516_s19 = smov %s1199_s20 }
 0x400   : > { %s1517_s20 = smov %s1359_s15  ;;  %s1518_s21 = smov %s1207_s22 }
 0x401   : > { %s1519_s22 = smov %s1521_s9  ;;  %21 = sbr.rel (!%p19_p9) target bundleno = 7 (0x7), region = 103 }
 0x408   :  { %738 = vsyncpa [#allocation4], 1 }
 0x409   :  { %740 = vsyncpa [#allocation4 + $0x1], 1 }
 0x40a   :  { %741 = vsyncpa [#allocation7], 1 }
 0x40b   :  { %742 = vsyncpa [#allocation5], 1 }
 0x40c   :  { %744 = vsyncpa [#allocation5 + $0x1], 1 }

</bundles_post_ra>
